<compile_context>
chip_gen: v5e
topology: v5e:2x2
jax: 0.10.0
libtpu: 0.0.40
codegen_flags: <defaults>
</compile_context>

<pallas_src>
import functools

import jax
import jax.numpy as jnp
from jax import lax
from jax.experimental import pallas as pl
from jax.experimental.pallas import tpu as pltpu


def _cdiv(a, b):
    return -(-a // b)


def _round_up(a, b):
    return _cdiv(a, b) * b


def _vmem_budgets():
    """Generation-aware VMEM sizing (64 MiB/TC on v7x, 128 MiB on v5e/v6e)."""
    try:
        cap = int(pltpu.get_tpu_info().vmem_capacity_bytes)
    except Exception:
        cap = 64 << 20  # conservative fallback (smallest per-TC VMEM, v7x)
    vmem_limit = min(int(cap * 0.85), cap - (4 << 20))
    block_budget = int(cap * 0.60)
    return vmem_limit, block_budget


# ----------------------------- Path A kernel --------------------------------
def _adain_fused_kernel(x_ref, w_ref, b_ref, o_ref, *, eps, inv_n):
    """Single-sweep AdaIN over a (row_tile, S) block (full spatial axis).

    One read of x feeds sum / sum-of-squares (var = E[x^2] - mean^2, clamped
    at 0 to guard cancellation), then out = x*scale + shift.  The one-pass
    variance is marginally less accurate than two-pass when |mean| >> std,
    but halves the in-VMEM load traffic and removes the (x - mean) temporary.
    """
    x = x_ref[...].astype(jnp.float32)
    mean = jnp.sum(x, axis=-1, keepdims=True) * inv_n            # (rows, 1)
    ex2 = jnp.sum(x * x, axis=-1, keepdims=True) * inv_n         # (rows, 1)
    var = jnp.maximum(ex2 - mean * mean, 0.0)                    # biased var
    scale = w_ref[...] * lax.rsqrt(var + eps)                    # (rows, 1)
    shift = b_ref[...] - mean * scale                            # (rows, 1)
    o_ref[...] = (x * scale + shift).astype(o_ref.dtype)


# ----------------------------- Path B kernels --------------------------------
def _adain_stats_kernel(x_ref, w_ref, b_ref, scale_ref, shift_ref,
                        sum_ref, ssq_ref, *, eps, inv_n, s_total, col_tile):
    """Pass 1: accumulate per-row sum / sum-of-squares across S tiles; on the
    last tile emit fused per-row scale / shift."""
    s = pl.program_id(1)
    n_s = pl.num_programs(1)

    @pl.when(s == 0)
    def _():
        sum_ref[...] = jnp.zeros_like(sum_ref)
        ssq_ref[...] = jnp.zeros_like(ssq_ref)

    x = x_ref[...].astype(jnp.float32)

    def accumulate(xv):
        sum_ref[...] += jnp.sum(xv, axis=-1, keepdims=True)
        ssq_ref[...] += jnp.sum(xv * xv, axis=-1, keepdims=True)

    if s_total % col_tile:
        # Ragged last S tile: out-of-bounds lanes hold unspecified values;
        # zero them before they reach the accumulators.  Static branch: only
        # the last grid step along S pays the mask.
        @pl.when(s < n_s - 1)
        def _():
            accumulate(x)

        @pl.when(s == n_s - 1)
        def _():
            col = lax.broadcasted_iota(jnp.int32, x.shape, 1)
            accumulate(jnp.where(col < (s_total - s * col_tile), x, 0.0))
    else:
        accumulate(x)

    @pl.when(s == n_s - 1)
    def _():
        mean = sum_ref[...] * inv_n
        # One-pass variance; clamp tiny negatives from cancellation.
        var = jnp.maximum(ssq_ref[...] * inv_n - mean * mean, 0.0)
        scale = w_ref[...] * lax.rsqrt(var + eps)
        scale_ref[...] = scale
        shift_ref[...] = b_ref[...] - mean * scale


def _adain_apply_kernel(x_ref, scale_ref, shift_ref, o_ref):
    """Pass 2: out = x * scale + shift (per-row affine)."""
    x = x_ref[...].astype(jnp.float32)
    o_ref[...] = (x * scale_ref[...] + shift_ref[...]).astype(o_ref.dtype)


# ------------------------------- wrapper -------------------------------------
def adaptive_instance_norm_3d(x, weight, bias, *, eps=1e-5, force_two_pass=False):
    """x: (B, C, D, H, W); weight, bias: (B*C,).  Returns (B, C, D, H, W)."""
    B, C, D, H, W = x.shape
    BC = B * C
    S = D * H * W
    assert weight.shape == (BC,) and bias.shape == (BC,)

    itemsize = jnp.dtype(x.dtype).itemsize
    sub = max(8, 32 // itemsize)          # sublane multiple: 8 f32, 16 bf16

    vmem_limit, block_budget = _vmem_budgets()

    x2d = x.reshape(BC, S)
    w2d = weight.reshape(BC, 1).astype(jnp.float32)
    b2d = bias.reshape(BC, 1).astype(jnp.float32)

    def compiler(sem):
        return pltpu.CompilerParams(dimension_semantics=sem,
                                    vmem_limit_bytes=vmem_limit)

    # Path A per-row VMEM bytes: double-buffered input + output blocks plus
    # one f32 temp sweep, plus the lane-padded (row, 1) weight/bias blocks.
    per_row_full = (4 * itemsize + 4) * S + 2 * 2 * 128 * 4
    rows_budget = block_budget // per_row_full
    use_two_pass = force_two_pass or rows_budget < min(sub, BC)

    if not use_two_pass:
        # -------------------- Path A: single fused pass ---------------------
        if BC <= sub:
            # Single row tile equal to the full row dim (allowed); both v7x
            # TensorCores cannot be used in this degenerate case.
            # TODO(synk): could split S across cores with a partial-sum combine.
            row_tile = BC
        else:
            row_tile = max(sub, (rows_budget // sub) * sub)
            # Keep >= ~8 grid steps (when BC permits) so megacore sharding
            # and the input/output pipeline both have work to overlap.
            row_tile = min(row_tile, _round_up(_cdiv(BC, 8), sub))
            n_row = _cdiv(BC, row_tile)
            row_tile = max(sub, _round_up(_cdiv(BC, n_row), sub))   # balance
        n_row = _cdiv(BC, row_tile)

        kernel = functools.partial(_adain_fused_kernel, eps=float(eps),
                                   inv_n=1.0 / float(S))
        cost = pl.CostEstimate(
            flops=int(7 * BC * S),
            transcendentals=int(BC),
            bytes_accessed=int(2 * BC * S * itemsize + 3 * BC * 4))

        out2d = pl.pallas_call(
            kernel,
            out_shape=jax.ShapeDtypeStruct((BC, S), x.dtype),
            grid_spec=pltpu.PrefetchScalarGridSpec(
                num_scalar_prefetch=0,
                grid=(n_row,),
                in_specs=[
                    pl.BlockSpec((row_tile, S), lambda i: (i, 0)),
                    pl.BlockSpec((row_tile, 1), lambda i: (i, 0)),
                    pl.BlockSpec((row_tile, 1), lambda i: (i, 0)),
                ],
                out_specs=pl.BlockSpec((row_tile, S), lambda i: (i, 0)),
            ),
            compiler_params=compiler(("parallel",)),
            cost_estimate=cost,
        )(x2d, w2d, b2d)
        return out2d.reshape(B, C, D, H, W)

    # ---------------- Path B: tiled-S two-pass streaming --------------------
    if BC <= sub:
        row_tile = BC
    else:
        row_tile = min(_round_up(_cdiv(BC, 2), sub), 256)
        n_row = _cdiv(BC, row_tile)
        row_tile = max(sub, _round_up(_cdiv(BC, n_row), sub))
    n_row = _cdiv(BC, row_tile)

    def pick_col_tile(per_elem_bytes, quantum):
        ct = block_budget // max(per_elem_bytes * row_tile, 1)
        ct = max(quantum, (ct // quantum) * quantum)
        if ct >= S:
            return S                      # full lane dim (no ragged tile)
        n = _cdiv(S, ct)
        return max(quantum, min(ct, _round_up(_cdiv(S, n), quantum)))

    # Pass 1 (stats) has no large output block -> its tile can be bigger than
    # pass 2's (apply), which streams both an input and an output block.
    col_stats = pick_col_tile(2 * itemsize + 4, 128)
    col_apply = pick_col_tile(4 * itemsize + 4, 512 if S >= 512 else 128)

    stats_kernel = functools.partial(
        _adain_stats_kernel, eps=float(eps), inv_n=1.0 / float(S),
        s_total=S, col_tile=col_stats)
    stats_cost = pl.CostEstimate(
        flops=int(3 * BC * S),
        transcendentals=int(BC),
        bytes_accessed=int(BC * S * itemsize + 4 * BC * 4))

    scale2d, shift2d = pl.pallas_call(
        stats_kernel,
        out_shape=(jax.ShapeDtypeStruct((BC, 1), jnp.float32),
                   jax.ShapeDtypeStruct((BC, 1), jnp.float32)),
        grid_spec=pltpu.PrefetchScalarGridSpec(
            num_scalar_prefetch=0,
            grid=(n_row, _cdiv(S, col_stats)),
            in_specs=[
                pl.BlockSpec((row_tile, col_stats), lambda i, s: (i, s)),
                pl.BlockSpec((row_tile, 1), lambda i, s: (i, 0)),
                pl.BlockSpec((row_tile, 1), lambda i, s: (i, 0)),
            ],
            out_specs=[
                pl.BlockSpec((row_tile, 1), lambda i, s: (i, 0)),
                pl.BlockSpec((row_tile, 1), lambda i, s: (i, 0)),
            ],
            scratch_shapes=[pltpu.VMEM((row_tile, 1), jnp.float32),
                            pltpu.VMEM((row_tile, 1), jnp.float32)]),
        compiler_params=compiler(("parallel", "arbitrary")),
        cost_estimate=stats_cost,
    )(x2d, w2d, b2d)

    apply_cost = pl.CostEstimate(
        flops=int(2 * BC * S),
        transcendentals=0,
        bytes_accessed=int(2 * BC * S * itemsize + 2 * BC * 4))

    out2d = pl.pallas_call(
        _adain_apply_kernel,
        out_shape=jax.ShapeDtypeStruct((BC, S), x.dtype),
        grid_spec=pltpu.PrefetchScalarGridSpec(
            num_scalar_prefetch=0,
            grid=(n_row, _cdiv(S, col_apply)),
            in_specs=[
                pl.BlockSpec((row_tile, col_apply), lambda i, s: (i, s)),
                pl.BlockSpec((row_tile, 1), lambda i, s: (i, 0)),
                pl.BlockSpec((row_tile, 1), lambda i, s: (i, 0)),
            ],
            out_specs=pl.BlockSpec((row_tile, col_apply), lambda i, s: (i, s)),
        ),
        compiler_params=compiler(("parallel", "parallel")),
        cost_estimate=apply_cost,
    )(x2d, scale2d, shift2d)

    return out2d.reshape(B, C, D, H, W)


# ------------------------------ reference ------------------------------------
def _reference(x, weight, bias, eps=1e-5):
    B, C, D, H, W = x.shape
    xr = x.reshape(B * C, -1).astype(jnp.float32)
    mean = xr.mean(axis=-1, keepdims=True)
    var = ((xr - mean) ** 2).mean(axis=-1, keepdims=True)
    out = (xr - mean) / jnp.sqrt(var + eps)
    out = out * weight[:, None] + bias[:, None]
    return out.reshape(B, C, D, H, W).astype(x.dtype)


if __name__ == "__main__":
    eps = 1e-5
    key = jax.random.PRNGKey(0)

    def make_inputs(k, B, C, D, H, W):
        kx, kw, kb = jax.random.split(k, 3)
        x = jax.random.normal(kx, (B, C, D, H, W), dtype=jnp.float32)
        # AdaIN's weight/bias come from a style MLP per (batch, channel);
        # emulate deterministically with shape (B * num_features,).
        weight = jax.random.normal(kw, (B * C,), dtype=jnp.float32) + 1.0
        bias = jax.random.normal(kb, (B * C,), dtype=jnp.float32)
        return x, weight, bias

    k1, k2 = jax.random.split(key)

    # 1) Small demo shape -> single fused pass (Path A).
    x, w, b = make_inputs(k1, 2, 4, 4, 8, 8)
    out = jax.block_until_ready(adaptive_instance_norm_3d(x, w, b, eps=eps))
    ref = _reference(x, w, b, eps=eps)
    assert out.shape == x.shape
    assert jnp.allclose(out, ref, atol=1e-4, rtol=1e-4), "path A mismatch"

    # 2) Odd shapes (ragged rows, non-multiple-of-128 spatial axis) -> Path A.
    x2, w2, b2 = make_inputs(k2, 2, 3, 3, 5, 7)
    out2 = jax.block_until_ready(adaptive_instance_norm_3d(x2, w2, b2, eps=eps))
    ref2 = _reference(x2, w2, b2, eps=eps)
    assert jnp.allclose(out2, ref2, atol=1e-4, rtol=1e-4), "path A (ragged) mismatch"

    # 3) Force the tiled-S two-pass streaming path (large-volume / v7x path).
    out3 = jax.block_until_ready(
        adaptive_instance_norm_3d(x2, w2, b2, eps=eps, force_two_pass=True))
    assert jnp.allclose(out3, ref2, atol=1e-4, rtol=1e-4), "path B mismatch"

    print("KERNEL_OK")
</pallas_src>

<mosaic_0001>
module attributes {stable_mosaic.version = 11 : i64} {
  func.func @_adain_fused_kernel(%arg0: i32, %arg1: memref<8x256xf32, #tpu.memory_space<vmem>>, %arg2: memref<8x1xf32, #tpu.memory_space<vmem>>, %arg3: memref<8x1xf32, #tpu.memory_space<vmem>>, %arg4: memref<8x256xf32, #tpu.memory_space<vmem>>) attributes {dimension_semantics = [#tpu.dimension_semantics<parallel>], iteration_bounds = array<i64: 1>, scalar_prefetch = 0 : i64, scratch_operands = 0 : i64, tpu.core_type = #tpu.core_type<tc>, window_params = [{transform_indices = @transform_0, window_bounds = array<i64: 8, 256>}, {transform_indices = @transform_1, window_bounds = array<i64: 8, 1>}, {transform_indices = @transform_2, window_bounds = array<i64: 8, 1>}, {transform_indices = @transform_3, window_bounds = array<i64: 8, 256>}]} {
    %c0 = arith.constant 0 : index
    %c0_0 = arith.constant 0 : index
    %0 = vector.load %arg1[%c0, %c0_0] : memref<8x256xf32, #tpu.memory_space<vmem>>, vector<8x256xf32>
    %cst = arith.constant dense<0.000000e+00> : vector<8xf32>
    %1 = vector.multi_reduction <add>, %0, %cst [1] : vector<8x256xf32> to vector<8xf32>
    %2 = vector.shape_cast %1 : vector<8xf32> to vector<8x1xf32>
    %cst_1 = arith.constant 3.906250e-03 : f32
    %3 = vector.broadcast %cst_1 : f32 to vector<8x1xf32>
    %4 = arith.mulf %2, %3 : vector<8x1xf32>
    %5 = arith.mulf %0, %0 : vector<8x256xf32>
    %cst_2 = arith.constant dense<0.000000e+00> : vector<8xf32>
    %6 = vector.multi_reduction <add>, %5, %cst_2 [1] : vector<8x256xf32> to vector<8xf32>
    %7 = vector.shape_cast %6 : vector<8xf32> to vector<8x1xf32>
    %cst_3 = arith.constant 3.906250e-03 : f32
    %8 = vector.broadcast %cst_3 : f32 to vector<8x1xf32>
    %9 = arith.mulf %7, %8 : vector<8x1xf32>
    %10 = arith.mulf %4, %4 : vector<8x1xf32>
    %11 = arith.subf %9, %10 : vector<8x1xf32>
    %cst_4 = arith.constant 0.000000e+00 : f32
    %12 = vector.broadcast %cst_4 : f32 to vector<8x1xf32>
    %13 = arith.maximumf %11, %12 : vector<8x1xf32>
    %c0_5 = arith.constant 0 : index
    %c0_6 = arith.constant 0 : index
    %14 = vector.load %arg2[%c0_5, %c0_6] : memref<8x1xf32, #tpu.memory_space<vmem>>, vector<8x1xf32>
    %cst_7 = arith.constant 9.99999974E-6 : f32
    %15 = vector.broadcast %cst_7 : f32 to vector<8x1xf32>
    %16 = arith.addf %13, %15 : vector<8x1xf32>
    %17 = math.rsqrt %16 : vector<8x1xf32>
    %18 = arith.mulf %14, %17 : vector<8x1xf32>
    %c0_8 = arith.constant 0 : index
    %c0_9 = arith.constant 0 : index
    %19 = vector.load %arg3[%c0_8, %c0_9] : memref<8x1xf32, #tpu.memory_space<vmem>>, vector<8x1xf32>
    %20 = arith.mulf %4, %18 : vector<8x1xf32>
    %21 = arith.subf %19, %20 : vector<8x1xf32>
    %22 = vector.broadcast %18 : vector<8x1xf32> to vector<8x256xf32>
    %23 = arith.mulf %0, %22 : vector<8x256xf32>
    %24 = vector.broadcast %21 : vector<8x1xf32> to vector<8x256xf32>
    %25 = arith.addf %23, %24 : vector<8x256xf32>
    %c0_10 = arith.constant 0 : index
    %c0_11 = arith.constant 0 : index
    %26 = vector.load %arg4[%c0_10, %c0_11] : memref<8x256xf32, #tpu.memory_space<vmem>>, vector<8x256xf32>
    tpu.vector_store %arg4[%c0_10, %c0_11], %25 {strides = array<i32>} : memref<8x256xf32, #tpu.memory_space<vmem>>, vector<8x256xf32>,
    return
  }
  func.func @transform_0(%arg0: i32) -> (i32, i32) {
    %c0_i32 = arith.constant 0 : i32
    %c0_i32_0 = arith.constant 0 : i32
    return %arg0, %c0_i32 : i32, i32
  }
  func.func @transform_1(%arg0: i32) -> (i32, i32) {
    %c0_i32 = arith.constant 0 : i32
    %c0_i32_0 = arith.constant 0 : i32
    return %arg0, %c0_i32 : i32, i32
  }
  func.func @transform_2(%arg0: i32) -> (i32, i32) {
    %c0_i32 = arith.constant 0 : i32
    %c0_i32_0 = arith.constant 0 : i32
    return %arg0, %c0_i32 : i32, i32
  }
  func.func @transform_3(%arg0: i32) -> (i32, i32) {
    %c0_i32 = arith.constant 0 : i32
    %c0_i32_0 = arith.constant 0 : i32
    return %arg0, %c0_i32 : i32, i32
  }
}

</mosaic_0001>

<bundles_post_ra>
// kernel: tpu_custom_call.1
= control target key start
LH: loop header
LB: loop body
LE: loop exit
PB: predicated region body
PF: predicated region fallthrough
CT: control target
= control target key end

     0   :  { %s147_s0 = inlined_call_operand.vmem [shape: f32[8,256], index: 0, kind: input, shape index: {}]   ;;  %s148_s1 = inlined_call_operand.vmem [shape: f32[8,1], index: 1, kind: input, shape index: {}]   ;;  %s149_s2 = inlined_call_operand.vmem [shape: f32[8,1], index: 2, kind: input, shape index: {}]   ;;  %s150_s3 = inlined_call_operand.hbm [shape: f32[8,256], index: 3, kind: output, shape index: {}]  }
   0x1   :  { %v15_v0 = vld [vmem:[%s147_s0] sm:$0xff]  ;;  %v16_v1 = vld [vmem:[%s147_s0 + $0x8] sm:$0xff] }
   0x2   :  { %8 = vsyncpa [#allocation3], 0  ;;  %v17_v2 = vadd.f32 %v16_v1, %v15_v0  ;;  %v21_v3 = vmul.f32 %v15_v0, %v15_v0  ;;  %v22_v4 = vmul.f32 %v16_v1, %v16_v1  ;;  %v110_v6 = vmov 0   ;;  %v30_v20 = vld [vmem:[%s148_s1] sm:$0xff]  ;;  %s111_s19 = smov [#allocation2]   ;;  %s69_s22 = sshll.u32 %s150_s3, 4  ;;  %s70_s22 = int_to_ptr.hbm [resolvable:$true] %s69_s22 }
   0x3   :  { %80 = vset.pattern.permute.xlu1 %v110_v6  ;;  %81 = vset.pattern.permute.xlu0 %v110_v6  ;;  %v43_v25 = vld [vmem:[%s149_s2] sm:$0xff]  ;;  %s67_s20 = sshll.u32 %s111_s19, 4  ;;  %s68_s20 = int_to_ptr.vmem [resolvable:$true] %s67_s20 }
   0x4   :  { %18 = vadd.xlane.f32.xlu0 %v17_v2  ;;  %v23_v5 = vadd.f32 %v22_v4, %v21_v3 }
   0xc   :  { %24 = vadd.xlane.f32.xlu0 %v23_v5 }
  0x77   :  { %v19_v7 = vpop.xlane.xlu0 %18 }
  0x78   :  { %v20_v8 = vmul.f32 0.00390625, %v19_v7 }
  0x7a   :  { %v27_v10 = vmul.f32 %v20_v8, %v20_v8 }
  0x7f   :  { %v25_v9 = vpop.xlane.xlu0 %24 }
  0x80   :  { %v26_v11 = vmul.f32 0.00390625, %v25_v9 }
  0x82   :  { %v28_v12 = vsub.f32 %v26_v11, %v27_v10 }
  0x84   :  { %v29_v13 = vmax.f32 %v28_v12, 0.0 }
  0x86   :  { %v31_v14 = vadd.f32 1e-05, %v29_v13 }
  0x88   :  { %82 = vrsqrt.f32 %v31_v14  ;;  %vm38_vm1 = vweird.f32 %v31_v14 }
  0x8e   :  { %v83_v15 = vpop.eup %82 }
  0x8f   :  { %v33_v16 = vmul.f32 %v83_v15, %v31_v14  ;;  %vm39_vm0 = vweird.f32 %v83_v15 }
  0x90   :  { %vm40_vm2 = vmor %vm38_vm1, %vm39_vm0 }
  0x91   :  { %v34_v17 = vmul.f32 %v83_v15, %v33_v16 }
  0x93   :  { %v35_v18 = vmul.f32 0.5, %v34_v17 }
  0x95   :  { %v36_v19 = vsub.f32 1.5, %v35_v18 }
  0x97   :  { %v37_v21 = vmul.f32 %v83_v15, %v36_v19 }
  0x99   :  { %v41_v22 = vsel %vm40_vm2, %v83_v15, %v37_v21 }
  0x9a   :  { %v42_v23 = vmul.f32 %v41_v22, %v30_v20 }
  0x9c   :  { %48 = vperm.xlu1 %80, %v42_v23   ;;  %v44_v24 = vmul.f32 %v42_v23, %v20_v8 }
  0x9e   :  { %v45_v26 = vsub.f32 %v43_v25, %v44_v24 }
  0xa4   :  { %55 = vperm.xlu1 %80, %v45_v26  }
 0x10e   :  { %v49_v27 = vpop.permute.xlu1 %48 }
 0x10f   :  { %v51_v28 = vmul.f32 %v49_v27, %v15_v0  ;;  %v52_v29 = vmul.f32 %v49_v27, %v16_v1 }
 0x116   :  { %v56_v30 = vpop.permute.xlu1 %55 }
 0x117   :  { %v58_v31 = vadd.f32 %v56_v30, %v51_v28  ;;  %v59_v32 = vadd.f32 %v56_v30, %v52_v29 }
 0x119   :  { %60 = vst [vmem:[#allocation2] sm:$0xff] %v58_v31 }
 0x11a   :  { %61 = vst [vmem:[#allocation2 + $0x8] sm:$0xff] %v59_v32 }
 0x11b   :  { %72 = dma.vmem_to_hbm [thread:$0]  %s68_s20, 256, %s70_s22, [#allocation3]  }
 0x11c   :  { %108 = dma.done.wait [#allocation3], 256  }
 0x11d   :  { %109 = vsyncadd [#allocation3], 4294967040 }
 0x11e   :  { %77 = vsyncpa [#allocation3], 1 }

</bundles_post_ra>
